<compile_context>
chip_gen: v7x
topology: tpu7x:2x2x1
jax: 0.10.0
libtpu: 0.0.40
codegen_flags: <defaults>
</compile_context>

<pallas_src>
import jax
import jax.numpy as jnp
from jax.experimental import pallas as pl
from jax.experimental.pallas import tpu as pltpu

_SUBLANE = 8


def _pointwise_conv_kernel(x_ref, w_ref, b_ref, o_ref, *, c_in, c_out, lanes):
    """Streaming 1x1 conv on a 2D (frames, channels*spatial) view.

    x_ref: (f_blk, c_in * lanes)   VMEM activations (channel-major slabs)
    w_ref: (c_in * c_out,)         SMEM weights, w_ref[c*c_out + o] == w[c, o]
    b_ref: (c_out,)                SMEM bias
    o_ref: (f_blk, c_out * lanes)  VMEM output (lane-dense slabs)
    """
    for o in range(c_out):
        # acc[f, l] = sum_c x[f, c*L + l] * w[c, o]   (f32 accumulate)
        acc = x_ref[:, 0:lanes].astype(jnp.float32) * w_ref[o]
        for c in range(1, c_in):
            acc = acc + (
                x_ref[:, c * lanes:(c + 1) * lanes].astype(jnp.float32)
                * w_ref[c * c_out + o]
            )
        o_ref[:, o * lanes:(o + 1) * lanes] = (acc + b_ref[o]).astype(o_ref.dtype)


def _pick_frame_block(f_total, c_in, c_out, lanes, dtype_bytes,
                      pipeline_budget_bytes=8 * 1024 * 1024,
                      min_split_frames=64):
    """Frames per grid step, from the honest double-buffered pipeline footprint.

    Per frame of a grid step the pipeline holds:
      2x input block  (double-buffered): 2 * c_in  * lanes * dtype_bytes
      2x output block (double-buffered): 2 * c_out * lanes * dtype_bytes
    In-kernel f32 slab temporaries are accounted for in _vmem_limit_bytes.
    """
    per_frame_pipeline = 2 * (c_in + c_out) * lanes * dtype_bytes
    cap = max(1, pipeline_budget_bytes // per_frame_pipeline)
    if cap >= _SUBLANE:
        cap -= cap % _SUBLANE            # keep blocks sublane-dense
    f_blk = min(cap, f_total)

    # Only force extra blocks (for v7x's two TensorCores) when each resulting
    # block stays big; on 1-TC chips the grid is a serial loop, so splitting a
    # small problem just adds per-step overhead.
    if f_blk == f_total and f_total >= 2 * min_split_frames:
        target_blocks = 4
        f_blk = max(min_split_frames, -(-f_total // target_blocks))
        f_blk = -(-f_blk // _SUBLANE) * _SUBLANE   # round up to multiple of 8

    # The block's sublane dim must be a multiple of 8 or equal the full extent.
    if f_total >= _SUBLANE and f_blk % _SUBLANE:
        f_blk = max(_SUBLANE, f_blk - f_blk % _SUBLANE)
    return max(1, min(f_blk, f_total))


def _vmem_limit_bytes(f_blk, c_in, c_out, lanes, dtype_bytes):
    pipeline = 2 * f_blk * (c_in + c_out) * lanes * dtype_bytes  # 2x in + 2x out
    temps = 2 * f_blk * lanes * 4                                # f32 cast slab + acc slab
    needed = pipeline + temps + (1 << 20)                        # 1 MiB slack
    # Clamp to a range safe on every generation (v5e scoped default 16 MiB,
    # v7x physical VMEM 64 MiB per TensorCore).
    return int(min(max(needed, 16 * 1024 * 1024), 32 * 1024 * 1024))


def pointwise_conv1x1_pallas(x_2d, w_flat, b_vec, *, c_in, c_out, lanes):
    """x_2d: (F, C_in*L), w_flat: (C_in*C_out,), b_vec: (C_out,) -> (F, C_out*L)."""
    f_total = x_2d.shape[0]
    dtype_bytes = jnp.dtype(x_2d.dtype).itemsize

    f_blk = _pick_frame_block(f_total, c_in, c_out, lanes, dtype_bytes)
    grid = (pl.cdiv(f_total, f_blk),)

    def kernel(x_ref, w_ref, b_ref, o_ref):
        _pointwise_conv_kernel(x_ref, w_ref, b_ref, o_ref,
                               c_in=c_in, c_out=c_out, lanes=lanes)

    return pl.pallas_call(
        kernel,
        out_shape=jax.ShapeDtypeStruct((f_total, c_out * lanes), x_2d.dtype),
        grid_spec=pltpu.PrefetchScalarGridSpec(
            num_scalar_prefetch=0,
            grid=grid,
            in_specs=[
                pl.BlockSpec((f_blk, c_in * lanes), lambda i: (i, 0)),       # activations
                pl.BlockSpec(memory_space=pltpu.MemorySpace.SMEM),           # weights
                pl.BlockSpec(memory_space=pltpu.MemorySpace.SMEM),           # bias
            ],
            out_specs=pl.BlockSpec((f_blk, c_out * lanes), lambda i: (i, 0)),
        ),
        compiler_params=pltpu.CompilerParams(
            dimension_semantics=("parallel",),
            vmem_limit_bytes=_vmem_limit_bytes(f_blk, c_in, c_out, lanes, dtype_bytes),
        ),
    )(x_2d, w_flat, b_vec)


def map_over_time2(x_btchw, w, b):
    """MapOverTime2(Conv2d(C_in, C_out, 1)) forward.

    x_btchw: (B, T, C_in, H, W)
    w:       (C_in, C_out)   (matmul form of PyTorch (C_out, C_in, 1, 1))
    b:       (C_out,)
    ->       (B, T, C_out, H, W)
    """
    B, T, C_in, H, W = x_btchw.shape
    C_out = w.shape[1]
    F, L = B * T, H * W

    # TODO(synk): the streaming VPU path fully unrolls over C_in*C_out; for very
    # large channel counts a dedicated MXU (channels-last matmul) kernel would
    # be needed instead. The module's 1x1 convs use tiny channel counts.
    if C_in * C_out > 4096:
        raise NotImplementedError("large-channel 1x1 conv needs an MXU kernel")

    # flatten(0, 1) and fold (C, H, W) -> C*L: pure reshapes, no transposes.
    x_2d = x_btchw.reshape(F, C_in * L)
    w_flat = w.reshape(-1).astype(jnp.float32)   # SMEM scalars, f32
    b_vec = b.astype(jnp.float32)

    y_2d = pointwise_conv1x1_pallas(x_2d, w_flat, b_vec,
                                    c_in=C_in, c_out=C_out, lanes=L)

    # unflatten(0, (B, T)) and restore (C_out, H, W): pure reshape again.
    return y_2d.reshape(B, T, C_out, H, W)


if __name__ == "__main__":
    # Small shapes consistent with the module: batch=2, time=4, channels=4, spatial=16.
    B, T, C_in, C_out, H, W = 2, 4, 4, 8, 16, 16

    key = jax.random.PRNGKey(0)
    kx, kw, kb = jax.random.split(key, 3)

    x = jax.random.normal(kx, (B, T, C_in, H, W), dtype=jnp.float32)
    # Conv2d(C_in, C_out, 1): PyTorch weight (C_out, C_in, 1, 1) stored in matmul
    # form (C_in, C_out); bias (C_out,).
    w = jax.random.normal(kw, (C_in, C_out), dtype=jnp.float32) * 0.1
    b = jax.random.normal(kb, (C_out,), dtype=jnp.float32) * 0.1

    out = jax.block_until_ready(map_over_time2(x, w, b))

    # Pure-JAX reference of the same forward.
    ref = jnp.einsum("btchw,co->btohw", x, w) + b[None, None, :, None, None]
    assert out.shape == (B, T, C_out, H, W)
    assert jnp.allclose(out, ref, atol=1e-5, rtol=1e-5)

    # TODO(synk): MapOverTime2 is a generic wrapper over arbitrary nn.Modules /
    # multiple args; only the per-frame 1x1-Conv2d case is implemented here.
    print("KERNEL_OK")
</pallas_src>

<mosaic_0001>
module attributes {stable_mosaic.version = 11 : i64} {
  func.func @kernel(%arg0: i32, %arg1: memref<8x1024xf32, #tpu.memory_space<vmem>>, %arg2: memref<32xf32, #tpu.memory_space<smem>>, %arg3: memref<8xf32, #tpu.memory_space<smem>>, %arg4: memref<8x2048xf32, #tpu.memory_space<vmem>>) attributes {dimension_semantics = [#tpu.dimension_semantics<parallel>], iteration_bounds = array<i64: 1>, scalar_prefetch = 0 : i64, scratch_operands = 0 : i64, tpu.core_type = #tpu.core_type<tc>, window_params = [{transform_indices = @transform_0, window_bounds = array<i64: 8, 1024>}, {transform_indices = @transform_1, window_bounds = array<i64: 32>}, {transform_indices = @transform_2, window_bounds = array<i64: 8>}, {transform_indices = @transform_3, window_bounds = array<i64: 8, 2048>}]} {
    %c0 = arith.constant 0 : index
    %c0_0 = arith.constant 0 : index
    %0 = vector.load %arg1[%c0, %c0_0] : memref<8x1024xf32, #tpu.memory_space<vmem>>, vector<8x256xf32>
    %c0_1 = arith.constant 0 : index
    %1 = memref.load %arg2[%c0_1] : memref<32xf32, #tpu.memory_space<smem>>
    %2 = vector.broadcast %1 : f32 to vector<8x256xf32>
    %3 = arith.mulf %0, %2 : vector<8x256xf32>
    %c0_2 = arith.constant 0 : index
    %c256 = arith.constant 256 : index
    %4 = vector.load %arg1[%c0_2, %c256] : memref<8x1024xf32, #tpu.memory_space<vmem>>, vector<8x256xf32>
    %c8 = arith.constant 8 : index
    %5 = memref.load %arg2[%c8] : memref<32xf32, #tpu.memory_space<smem>>
    %6 = vector.broadcast %5 : f32 to vector<8x256xf32>
    %7 = arith.mulf %4, %6 : vector<8x256xf32>
    %8 = arith.addf %3, %7 : vector<8x256xf32>
    %c0_3 = arith.constant 0 : index
    %c512 = arith.constant 512 : index
    %9 = vector.load %arg1[%c0_3, %c512] : memref<8x1024xf32, #tpu.memory_space<vmem>>, vector<8x256xf32>
    %c16 = arith.constant 16 : index
    %10 = memref.load %arg2[%c16] : memref<32xf32, #tpu.memory_space<smem>>
    %11 = vector.broadcast %10 : f32 to vector<8x256xf32>
    %12 = arith.mulf %9, %11 : vector<8x256xf32>
    %13 = arith.addf %8, %12 : vector<8x256xf32>
    %c0_4 = arith.constant 0 : index
    %c768 = arith.constant 768 : index
    %14 = vector.load %arg1[%c0_4, %c768] : memref<8x1024xf32, #tpu.memory_space<vmem>>, vector<8x256xf32>
    %c24 = arith.constant 24 : index
    %15 = memref.load %arg2[%c24] : memref<32xf32, #tpu.memory_space<smem>>
    %16 = vector.broadcast %15 : f32 to vector<8x256xf32>
    %17 = arith.mulf %14, %16 : vector<8x256xf32>
    %18 = arith.addf %13, %17 : vector<8x256xf32>
    %c0_5 = arith.constant 0 : index
    %19 = memref.load %arg3[%c0_5] : memref<8xf32, #tpu.memory_space<smem>>
    %20 = vector.broadcast %19 : f32 to vector<8x256xf32>
    %21 = arith.addf %18, %20 : vector<8x256xf32>
    %c0_6 = arith.constant 0 : index
    %c0_7 = arith.constant 0 : index
    %22 = vector.load %arg4[%c0_6, %c0_7] : memref<8x2048xf32, #tpu.memory_space<vmem>>, vector<8x256xf32>
    tpu.vector_store %arg4[%c0_6, %c0_7], %21 {strides = array<i32>} : memref<8x2048xf32, #tpu.memory_space<vmem>>, vector<8x256xf32>,
    %c0_8 = arith.constant 0 : index
    %c0_9 = arith.constant 0 : index
    %23 = vector.load %arg1[%c0_8, %c0_9] : memref<8x1024xf32, #tpu.memory_space<vmem>>, vector<8x256xf32>
    %c1 = arith.constant 1 : index
    %24 = memref.load %arg2[%c1] : memref<32xf32, #tpu.memory_space<smem>>
    %25 = vector.broadcast %24 : f32 to vector<8x256xf32>
    %26 = arith.mulf %23, %25 : vector<8x256xf32>
    %c0_10 = arith.constant 0 : index
    %c256_11 = arith.constant 256 : index
    %27 = vector.load %arg1[%c0_10, %c256_11] : memref<8x1024xf32, #tpu.memory_space<vmem>>, vector<8x256xf32>
    %c9 = arith.constant 9 : index
    %28 = memref.load %arg2[%c9] : memref<32xf32, #tpu.memory_space<smem>>
    %29 = vector.broadcast %28 : f32 to vector<8x256xf32>
    %30 = arith.mulf %27, %29 : vector<8x256xf32>
    %31 = arith.addf %26, %30 : vector<8x256xf32>
    %c0_12 = arith.constant 0 : index
    %c512_13 = arith.constant 512 : index
    %32 = vector.load %arg1[%c0_12, %c512_13] : memref<8x1024xf32, #tpu.memory_space<vmem>>, vector<8x256xf32>
    %c17 = arith.constant 17 : index
    %33 = memref.load %arg2[%c17] : memref<32xf32, #tpu.memory_space<smem>>
    %34 = vector.broadcast %33 : f32 to vector<8x256xf32>
    %35 = arith.mulf %32, %34 : vector<8x256xf32>
    %36 = arith.addf %31, %35 : vector<8x256xf32>
    %c0_14 = arith.constant 0 : index
    %c768_15 = arith.constant 768 : index
    %37 = vector.load %arg1[%c0_14, %c768_15] : memref<8x1024xf32, #tpu.memory_space<vmem>>, vector<8x256xf32>
    %c25 = arith.constant 25 : index
    %38 = memref.load %arg2[%c25] : memref<32xf32, #tpu.memory_space<smem>>
    %39 = vector.broadcast %38 : f32 to vector<8x256xf32>
    %40 = arith.mulf %37, %39 : vector<8x256xf32>
    %41 = arith.addf %36, %40 : vector<8x256xf32>
    %c1_16 = arith.constant 1 : index
    %42 = memref.load %arg3[%c1_16] : memref<8xf32, #tpu.memory_space<smem>>
    %43 = vector.broadcast %42 : f32 to vector<8x256xf32>
    %44 = arith.addf %41, %43 : vector<8x256xf32>
    %c0_17 = arith.constant 0 : index
    %c256_18 = arith.constant 256 : index
    %45 = vector.load %arg4[%c0_17, %c256_18] : memref<8x2048xf32, #tpu.memory_space<vmem>>, vector<8x256xf32>
    tpu.vector_store %arg4[%c0_17, %c256_18], %44 {strides = array<i32>} : memref<8x2048xf32, #tpu.memory_space<vmem>>, vector<8x256xf32>,
    %c0_19 = arith.constant 0 : index
    %c0_20 = arith.constant 0 : index
    %46 = vector.load %arg1[%c0_19, %c0_20] : memref<8x1024xf32, #tpu.memory_space<vmem>>, vector<8x256xf32>
    %c2 = arith.constant 2 : index
    %47 = memref.load %arg2[%c2] : memref<32xf32, #tpu.memory_space<smem>>
    %48 = vector.broadcast %47 : f32 to vector<8x256xf32>
    %49 = arith.mulf %46, %48 : vector<8x256xf32>
    %c0_21 = arith.constant 0 : index
    %c256_22 = arith.constant 256 : index
    %50 = vector.load %arg1[%c0_21, %c256_22] : memref<8x1024xf32, #tpu.memory_space<vmem>>, vector<8x256xf32>
    %c10 = arith.constant 10 : index
    %51 = memref.load %arg2[%c10] : memref<32xf32, #tpu.memory_space<smem>>
    %52 = vector.broadcast %51 : f32 to vector<8x256xf32>
    %53 = arith.mulf %50, %52 : vector<8x256xf32>
    %54 = arith.addf %49, %53 : vector<8x256xf32>
    %c0_23 = arith.constant 0 : index
    %c512_24 = arith.constant 512 : index
    %55 = vector.load %arg1[%c0_23, %c512_24] : memref<8x1024xf32, #tpu.memory_space<vmem>>, vector<8x256xf32>
    %c18 = arith.constant 18 : index
    %56 = memref.load %arg2[%c18] : memref<32xf32, #tpu.memory_space<smem>>
    %57 = vector.broadcast %56 : f32 to vector<8x256xf32>
    %58 = arith.mulf %55, %57 : vector<8x256xf32>
    %59 = arith.addf %54, %58 : vector<8x256xf32>
    %c0_25 = arith.constant 0 : index
    %c768_26 = arith.constant 768 : index
    %60 = vector.load %arg1[%c0_25, %c768_26] : memref<8x1024xf32, #tpu.memory_space<vmem>>, vector<8x256xf32>
    %c26 = arith.constant 26 : index
    %61 = memref.load %arg2[%c26] : memref<32xf32, #tpu.memory_space<smem>>
    %62 = vector.broadcast %61 : f32 to vector<8x256xf32>
    %63 = arith.mulf %60, %62 : vector<8x256xf32>
    %64 = arith.addf %59, %63 : vector<8x256xf32>
    %c2_27 = arith.constant 2 : index
    %65 = memref.load %arg3[%c2_27] : memref<8xf32, #tpu.memory_space<smem>>
    %66 = vector.broadcast %65 : f32 to vector<8x256xf32>
    %67 = arith.addf %64, %66 : vector<8x256xf32>
    %c0_28 = arith.constant 0 : index
    %c512_29 = arith.constant 512 : index
    %68 = vector.load %arg4[%c0_28, %c512_29] : memref<8x2048xf32, #tpu.memory_space<vmem>>, vector<8x256xf32>
    tpu.vector_store %arg4[%c0_28, %c512_29], %67 {strides = array<i32>} : memref<8x2048xf32, #tpu.memory_space<vmem>>, vector<8x256xf32>,
    %c0_30 = arith.constant 0 : index
    %c0_31 = arith.constant 0 : index
    %69 = vector.load %arg1[%c0_30, %c0_31] : memref<8x1024xf32, #tpu.memory_space<vmem>>, vector<8x256xf32>
    %c3 = arith.constant 3 : index
    %70 = memref.load %arg2[%c3] : memref<32xf32, #tpu.memory_space<smem>>
    %71 = vector.broadcast %70 : f32 to vector<8x256xf32>
    %72 = arith.mulf %69, %71 : vector<8x256xf32>
    %c0_32 = arith.constant 0 : index
    %c256_33 = arith.constant 256 : index
    %73 = vector.load %arg1[%c0_32, %c256_33] : memref<8x1024xf32, #tpu.memory_space<vmem>>, vector<8x256xf32>
    %c11 = arith.constant 11 : index
    %74 = memref.load %arg2[%c11] : memref<32xf32, #tpu.memory_space<smem>>
    %75 = vector.broadcast %74 : f32 to vector<8x256xf32>
    %76 = arith.mulf %73, %75 : vector<8x256xf32>
    %77 = arith.addf %72, %76 : vector<8x256xf32>
    %c0_34 = arith.constant 0 : index
    %c512_35 = arith.constant 512 : index
    %78 = vector.load %arg1[%c0_34, %c512_35] : memref<8x1024xf32, #tpu.memory_space<vmem>>, vector<8x256xf32>
    %c19 = arith.constant 19 : index
    %79 = memref.load %arg2[%c19] : memref<32xf32, #tpu.memory_space<smem>>
    %80 = vector.broadcast %79 : f32 to vector<8x256xf32>
    %81 = arith.mulf %78, %80 : vector<8x256xf32>
    %82 = arith.addf %77, %81 : vector<8x256xf32>
    %c0_36 = arith.constant 0 : index
    %c768_37 = arith.constant 768 : index
    %83 = vector.load %arg1[%c0_36, %c768_37] : memref<8x1024xf32, #tpu.memory_space<vmem>>, vector<8x256xf32>
    %c27 = arith.constant 27 : index
    %84 = memref.load %arg2[%c27] : memref<32xf32, #tpu.memory_space<smem>>
    %85 = vector.broadcast %84 : f32 to vector<8x256xf32>
    %86 = arith.mulf %83, %85 : vector<8x256xf32>
    %87 = arith.addf %82, %86 : vector<8x256xf32>
    %c3_38 = arith.constant 3 : index
    %88 = memref.load %arg3[%c3_38] : memref<8xf32, #tpu.memory_space<smem>>
    %89 = vector.broadcast %88 : f32 to vector<8x256xf32>
    %90 = arith.addf %87, %89 : vector<8x256xf32>
    %c0_39 = arith.constant 0 : index
    %c768_40 = arith.constant 768 : index
    %91 = vector.load %arg4[%c0_39, %c768_40] : memref<8x2048xf32, #tpu.memory_space<vmem>>, vector<8x256xf32>
    tpu.vector_store %arg4[%c0_39, %c768_40], %90 {strides = array<i32>} : memref<8x2048xf32, #tpu.memory_space<vmem>>, vector<8x256xf32>,
    %c0_41 = arith.constant 0 : index
    %c0_42 = arith.constant 0 : index
    %92 = vector.load %arg1[%c0_41, %c0_42] : memref<8x1024xf32, #tpu.memory_space<vmem>>, vector<8x256xf32>
    %c4 = arith.constant 4 : index
    %93 = memref.load %arg2[%c4] : memref<32xf32, #tpu.memory_space<smem>>
    %94 = vector.broadcast %93 : f32 to vector<8x256xf32>
    %95 = arith.mulf %92, %94 : vector<8x256xf32>
    %c0_43 = arith.constant 0 : index
    %c256_44 = arith.constant 256 : index
    %96 = vector.load %arg1[%c0_43, %c256_44] : memref<8x1024xf32, #tpu.memory_space<vmem>>, vector<8x256xf32>
    %c12 = arith.constant 12 : index
    %97 = memref.load %arg2[%c12] : memref<32xf32, #tpu.memory_space<smem>>
    %98 = vector.broadcast %97 : f32 to vector<8x256xf32>
    %99 = arith.mulf %96, %98 : vector<8x256xf32>
    %100 = arith.addf %95, %99 : vector<8x256xf32>
    %c0_45 = arith.constant 0 : index
    %c512_46 = arith.constant 512 : index
    %101 = vector.load %arg1[%c0_45, %c512_46] : memref<8x1024xf32, #tpu.memory_space<vmem>>, vector<8x256xf32>
    %c20 = arith.constant 20 : index
    %102 = memref.load %arg2[%c20] : memref<32xf32, #tpu.memory_space<smem>>
    %103 = vector.broadcast %102 : f32 to vector<8x256xf32>
    %104 = arith.mulf %101, %103 : vector<8x256xf32>
    %105 = arith.addf %100, %104 : vector<8x256xf32>
    %c0_47 = arith.constant 0 : index
    %c768_48 = arith.constant 768 : index
    %106 = vector.load %arg1[%c0_47, %c768_48] : memref<8x1024xf32, #tpu.memory_space<vmem>>, vector<8x256xf32>
    %c28 = arith.constant 28 : index
    %107 = memref.load %arg2[%c28] : memref<32xf32, #tpu.memory_space<smem>>
    %108 = vector.broadcast %107 : f32 to vector<8x256xf32>
    %109 = arith.mulf %106, %108 : vector<8x256xf32>
    %110 = arith.addf %105, %109 : vector<8x256xf32>
    %c4_49 = arith.constant 4 : index
    %111 = memref.load %arg3[%c4_49] : memref<8xf32, #tpu.memory_space<smem>>
    %112 = vector.broadcast %111 : f32 to vector<8x256xf32>
    %113 = arith.addf %110, %112 : vector<8x256xf32>
    %c0_50 = arith.constant 0 : index
    %c1024 = arith.constant 1024 : index
    %114 = vector.load %arg4[%c0_50, %c1024] : memref<8x2048xf32, #tpu.memory_space<vmem>>, vector<8x256xf32>
    tpu.vector_store %arg4[%c0_50, %c1024], %113 {strides = array<i32>} : memref<8x2048xf32, #tpu.memory_space<vmem>>, vector<8x256xf32>,
    %c0_51 = arith.constant 0 : index
    %c0_52 = arith.constant 0 : index
    %115 = vector.load %arg1[%c0_51, %c0_52] : memref<8x1024xf32, #tpu.memory_space<vmem>>, vector<8x256xf32>
    %c5 = arith.constant 5 : index
    %116 = memref.load %arg2[%c5] : memref<32xf32, #tpu.memory_space<smem>>
    %117 = vector.broadcast %116 : f32 to vector<8x256xf32>
    %118 = arith.mulf %115, %117 : vector<8x256xf32>
    %c0_53 = arith.constant 0 : index
    %c256_54 = arith.constant 256 : index
    %119 = vector.load %arg1[%c0_53, %c256_54] : memref<8x1024xf32, #tpu.memory_space<vmem>>, vector<8x256xf32>
    %c13 = arith.constant 13 : index
    %120 = memref.load %arg2[%c13] : memref<32xf32, #tpu.memory_space<smem>>
    %121 = vector.broadcast %120 : f32 to vector<8x256xf32>
    %122 = arith.mulf %119, %121 : vector<8x256xf32>
    %123 = arith.addf %118, %122 : vector<8x256xf32>
    %c0_55 = arith.constant 0 : index
    %c512_56 = arith.constant 512 : index
    %124 = vector.load %arg1[%c0_55, %c512_56] : memref<8x1024xf32, #tpu.memory_space<vmem>>, vector<8x256xf32>
    %c21 = arith.constant 21 : index
    %125 = memref.load %arg2[%c21] : memref<32xf32, #tpu.memory_space<smem>>
    %126 = vector.broadcast %125 : f32 to vector<8x256xf32>
    %127 = arith.mulf %124, %126 : vector<8x256xf32>
    %128 = arith.addf %123, %127 : vector<8x256xf32>
    %c0_57 = arith.constant 0 : index
    %c768_58 = arith.constant 768 : index
    %129 = vector.load %arg1[%c0_57, %c768_58] : memref<8x1024xf32, #tpu.memory_space<vmem>>, vector<8x256xf32>
    %c29 = arith.constant 29 : index
    %130 = memref.load %arg2[%c29] : memref<32xf32, #tpu.memory_space<smem>>
    %131 = vector.broadcast %130 : f32 to vector<8x256xf32>
    %132 = arith.mulf %129, %131 : vector<8x256xf32>
    %133 = arith.addf %128, %132 : vector<8x256xf32>
    %c5_59 = arith.constant 5 : index
    %134 = memref.load %arg3[%c5_59] : memref<8xf32, #tpu.memory_space<smem>>
    %135 = vector.broadcast %134 : f32 to vector<8x256xf32>
    %136 = arith.addf %133, %135 : vector<8x256xf32>
    %c0_60 = arith.constant 0 : index
    %c1280 = arith.constant 1280 : index
    %137 = vector.load %arg4[%c0_60, %c1280] : memref<8x2048xf32, #tpu.memory_space<vmem>>, vector<8x256xf32>
    tpu.vector_store %arg4[%c0_60, %c1280], %136 {strides = array<i32>} : memref<8x2048xf32, #tpu.memory_space<vmem>>, vector<8x256xf32>,
    %c0_61 = arith.constant 0 : index
    %c0_62 = arith.constant 0 : index
    %138 = vector.load %arg1[%c0_61, %c0_62] : memref<8x1024xf32, #tpu.memory_space<vmem>>, vector<8x256xf32>
    %c6 = arith.constant 6 : index
    %139 = memref.load %arg2[%c6] : memref<32xf32, #tpu.memory_space<smem>>
    %140 = vector.broadcast %139 : f32 to vector<8x256xf32>
    %141 = arith.mulf %138, %140 : vector<8x256xf32>
    %c0_63 = arith.constant 0 : index
    %c256_64 = arith.constant 256 : index
    %142 = vector.load %arg1[%c0_63, %c256_64] : memref<8x1024xf32, #tpu.memory_space<vmem>>, vector<8x256xf32>
    %c14 = arith.constant 14 : index
    %143 = memref.load %arg2[%c14] : memref<32xf32, #tpu.memory_space<smem>>
    %144 = vector.broadcast %143 : f32 to vector<8x256xf32>
    %145 = arith.mulf %142, %144 : vector<8x256xf32>
    %146 = arith.addf %141, %145 : vector<8x256xf32>
    %c0_65 = arith.constant 0 : index
    %c512_66 = arith.constant 512 : index
    %147 = vector.load %arg1[%c0_65, %c512_66] : memref<8x1024xf32, #tpu.memory_space<vmem>>, vector<8x256xf32>
    %c22 = arith.constant 22 : index
    %148 = memref.load %arg2[%c22] : memref<32xf32, #tpu.memory_space<smem>>
    %149 = vector.broadcast %148 : f32 to vector<8x256xf32>
    %150 = arith.mulf %147, %149 : vector<8x256xf32>
    %151 = arith.addf %146, %150 : vector<8x256xf32>
    %c0_67 = arith.constant 0 : index
    %c768_68 = arith.constant 768 : index
    %152 = vector.load %arg1[%c0_67, %c768_68] : memref<8x1024xf32, #tpu.memory_space<vmem>>, vector<8x256xf32>
    %c30 = arith.constant 30 : index
    %153 = memref.load %arg2[%c30] : memref<32xf32, #tpu.memory_space<smem>>
    %154 = vector.broadcast %153 : f32 to vector<8x256xf32>
    %155 = arith.mulf %152, %154 : vector<8x256xf32>
    %156 = arith.addf %151, %155 : vector<8x256xf32>
    %c6_69 = arith.constant 6 : index
    %157 = memref.load %arg3[%c6_69] : memref<8xf32, #tpu.memory_space<smem>>
    %158 = vector.broadcast %157 : f32 to vector<8x256xf32>
    %159 = arith.addf %156, %158 : vector<8x256xf32>
    %c0_70 = arith.constant 0 : index
    %c1536 = arith.constant 1536 : index
    %160 = vector.load %arg4[%c0_70, %c1536] : memref<8x2048xf32, #tpu.memory_space<vmem>>, vector<8x256xf32>
    tpu.vector_store %arg4[%c0_70, %c1536], %159 {strides = array<i32>} : memref<8x2048xf32, #tpu.memory_space<vmem>>, vector<8x256xf32>,
    %c0_71 = arith.constant 0 : index
    %c0_72 = arith.constant 0 : index
    %161 = vector.load %arg1[%c0_71, %c0_72] : memref<8x1024xf32, #tpu.memory_space<vmem>>, vector<8x256xf32>
    %c7 = arith.constant 7 : index
    %162 = memref.load %arg2[%c7] : memref<32xf32, #tpu.memory_space<smem>>
    %163 = vector.broadcast %162 : f32 to vector<8x256xf32>
    %164 = arith.mulf %161, %163 : vector<8x256xf32>
    %c0_73 = arith.constant 0 : index
    %c256_74 = arith.constant 256 : index
    %165 = vector.load %arg1[%c0_73, %c256_74] : memref<8x1024xf32, #tpu.memory_space<vmem>>, vector<8x256xf32>
    %c15 = arith.constant 15 : index
    %166 = memref.load %arg2[%c15] : memref<32xf32, #tpu.memory_space<smem>>
    %167 = vector.broadcast %166 : f32 to vector<8x256xf32>
    %168 = arith.mulf %165, %167 : vector<8x256xf32>
    %169 = arith.addf %164, %168 : vector<8x256xf32>
    %c0_75 = arith.constant 0 : index
    %c512_76 = arith.constant 512 : index
    %170 = vector.load %arg1[%c0_75, %c512_76] : memref<8x1024xf32, #tpu.memory_space<vmem>>, vector<8x256xf32>
    %c23 = arith.constant 23 : index
    %171 = memref.load %arg2[%c23] : memref<32xf32, #tpu.memory_space<smem>>
    %172 = vector.broadcast %171 : f32 to vector<8x256xf32>
    %173 = arith.mulf %170, %172 : vector<8x256xf32>
    %174 = arith.addf %169, %173 : vector<8x256xf32>
    %c0_77 = arith.constant 0 : index
    %c768_78 = arith.constant 768 : index
    %175 = vector.load %arg1[%c0_77, %c768_78] : memref<8x1024xf32, #tpu.memory_space<vmem>>, vector<8x256xf32>
    %c31 = arith.constant 31 : index
    %176 = memref.load %arg2[%c31] : memref<32xf32, #tpu.memory_space<smem>>
    %177 = vector.broadcast %176 : f32 to vector<8x256xf32>
    %178 = arith.mulf %175, %177 : vector<8x256xf32>
    %179 = arith.addf %174, %178 : vector<8x256xf32>
    %c7_79 = arith.constant 7 : index
    %180 = memref.load %arg3[%c7_79] : memref<8xf32, #tpu.memory_space<smem>>
    %181 = vector.broadcast %180 : f32 to vector<8x256xf32>
    %182 = arith.addf %179, %181 : vector<8x256xf32>
    %c0_80 = arith.constant 0 : index
    %c1792 = arith.constant 1792 : index
    %183 = vector.load %arg4[%c0_80, %c1792] : memref<8x2048xf32, #tpu.memory_space<vmem>>, vector<8x256xf32>
    tpu.vector_store %arg4[%c0_80, %c1792], %182 {strides = array<i32>} : memref<8x2048xf32, #tpu.memory_space<vmem>>, vector<8x256xf32>,
    return
  }
  func.func @transform_0(%arg0: i32) -> (i32, i32) {
    %c0_i32 = arith.constant 0 : i32
    %c0_i32_0 = arith.constant 0 : i32
    return %arg0, %c0_i32 : i32, i32
  }
  func.func @transform_1(%arg0: i32) -> i32 {
    %c0_i32 = arith.constant 0 : i32
    %c0_i32_0 = arith.constant 0 : i32
    return %c0_i32 : i32
  }
  func.func @transform_2(%arg0: i32) -> i32 {
    %c0_i32 = arith.constant 0 : i32
    %c0_i32_0 = arith.constant 0 : i32
    return %c0_i32 : i32
  }
  func.func @transform_3(%arg0: i32) -> (i32, i32) {
    %c0_i32 = arith.constant 0 : i32
    %c0_i32_0 = arith.constant 0 : i32
    return %arg0, %c0_i32 : i32, i32
  }
}

</mosaic_0001>

<bundles_post_ra>
// kernel: tpu_custom_call.1
= control target key start
LH: loop header
LB: loop body
LE: loop exit
PB: predicated region body
PF: predicated region fallthrough
CT: control target
= control target key end

     0   :  { %8 = vsyncpa [#allocation3], 0  ;;  %s726_s0 = inlined_call_operand.hbm [shape: f32[8,1024], index: 0, kind: input, shape index: {}]   ;;  %s727_s1 = inlined_call_operand.vmem [shape: f32[32], index: 1, kind: input, shape index: {}]   ;;  %s728_s2 = inlined_call_operand.vmem [shape: f32[8], index: 2, kind: input, shape index: {}]   ;;  %s729_s3 = inlined_call_operand.hbm [shape: f32[8,2048], index: 3, kind: output, shape index: {}]  }
   0x1   :  { %9 = vsyncpa [#allocation5], 0 }
   0x2   :  { %10 = vsyncpa [#allocation8], 0 }
   0x3   :  { %11 = vsyncpa [#allocation4], 0  ;;  %s28_s14 = sshll.u32 %s727_s1, 4  ;;  %s475_s15 = smov [#allocation2]   ;;  %s29_s14 = int_to_ptr.vmem [resolvable:$true] %s28_s14 }
   0x4   :  { %s18_s16 = sshll.u32 %s475_s15, 4  ;;  %s399_s19 = scalar_lea.hbm %s726_s0, 1024  ;;  %s19_s16 = int_to_ptr.vmem [resolvable:$true] %s18_s16 }
   0x5   :  { %p400_p0 = scmp.ne.s32.totalorder %s726_s0, %s399_s19  ;;  %p403_p1 = scmp.lt.u32.totalorder %s399_s19, %s726_s0 }
   0x7   :  { %p405_p2 = pnand %p403_p1, %p400_p0 }
   0x9   :  { %408 = shalt.err (!%p405_p2)
}
   0xa   :  { %s409_s24 = scalar_lea.vmem %s19_s16, 1024  ;;  %p414_p4 = scmp.lt.s32.totalorder %s19_s16, %s19_s16 }
   0xb   :  { %p410_p3 = scmp.ne.s32.totalorder %s19_s16, %s409_s24  ;;  %p415_p5 = scmp.lt.s32.totalorder %s409_s24, %s409_s24 }
   0xd   :  { %p416_p6 = por %p415_p5, %p414_p4 }
   0xf   :  { %p417_p7 = pnand %p416_p6, %p410_p3 }
  0x11   :  { %420 = shalt.err (!%p417_p7)
}
  0x12   :  { %21 = dma.hbm_to_vmem [thread:$0]  %s726_s0, 1024, %s19_s16, [#allocation3]  }
  0x13   :  { %s421_s26 = scalar_lea.vmem %s29_s14, 16  ;;  %p426_p9 = scmp.lt.s32.totalorder %s29_s14, %s29_s14 }
  0x14   :  { %p422_p8 = scmp.ne.s32.totalorder %s29_s14, %s421_s26  ;;  %p427_p10 = scmp.lt.s32.totalorder %s421_s26, %s421_s26 }
  0x16   :  { %p428_p11 = por %p427_p10, %p426_p9 }
  0x18   :  { %p429_p12 = pnand %p428_p11, %p422_p8 }
  0x1a   :  { %432 = shalt.err (!%p429_p12)
}
  0x1b   :  { %s476_s27 = smov [#allocation6]   ;;  %s38_s30 = sshll.u32 %s728_s2, 4  ;;  %s39_s30 = int_to_ptr.vmem [resolvable:$true] %s38_s30 }
  0x1c   :  { %31 = dma.vmem_to_smem %s29_s14, 16, %s476_s27, [#allocation5]  }
  0x1d   :  { %s433_s4 = scalar_lea.vmem %s39_s30, 16  ;;  %p438_p0 = scmp.lt.s32.totalorder %s39_s30, %s39_s30 }
  0x1e   :  { %p434_p13 = scmp.ne.s32.totalorder %s39_s30, %s433_s4  ;;  %p439_p1 = scmp.lt.s32.totalorder %s433_s4, %s433_s4 }
  0x20   :  { %p440_p2 = por %p439_p1, %p438_p0 }
  0x22   :  { %p441_p3 = pnand %p440_p2, %p434_p13 }
  0x24   :  { %444 = shalt.err (!%p441_p3)
}
  0x25   :  { %s477_s0 = smov [#allocation7]  }
  0x26   :  { %41 = dma.vmem_to_smem %s39_s30, 16, %s477_s0, [#allocation8]  }
  0x27   :  { %467 = dma.done.wait [#allocation3], 1024  }
  0x28   :  { %468 = vsyncadd [#allocation3], 4294966272 }
  0x29   :  { %469 = dma.done.wait [#allocation5], 16  }
  0x2a   :  { %470 = vsyncadd [#allocation5], 4294967280 }
  0x2b   :  { %471 = dma.done.wait [#allocation8], 16  }
  0x2c   :  { %472 = vsyncadd [#allocation8], 4294967280 }
  0x2d   :  { %51 = sfence }
  0x2e   :  { %s54_s5 = sld [smem:[#allocation6]]  ;;  %v525_v0 = vld [vmem:[#allocation2] sm:$0xff]  ;;  %s527_s9 = sld [smem:[#allocation6 + $0x1]]  ;;  %v531_v1 = vld [vmem:[#allocation2 + $0x10] sm:$0xff]  ;;  %v541_v4 = vld [vmem:[#allocation2 + $0x8] sm:$0xff] }
  0x2f   :  { %s517_s6 = sld [smem:[#allocation6 + $0x8]]  ;;  %s529_s10 = sld [smem:[#allocation6 + $0x9]]  ;;  %v533_v2 = vld [vmem:[#allocation2 + $0x20] sm:$0xff]  ;;  %v539_v3 = vld [vmem:[#allocation2 + $0x30] sm:$0xff]  ;;  %v543_v5 = vld [vmem:[#allocation2 + $0x18] sm:$0xff] }
  0x30   :  { %s519_s2 = sld [smem:[#allocation6 + $0x10]]  ;;  %s535_s11 = sld [smem:[#allocation6 + $0x11]]  ;;  %v548_v8 = vld [vmem:[#allocation2 + $0x28] sm:$0xff]  ;;  %v550_v9 = vld [vmem:[#allocation2 + $0x38] sm:$0xff] }
  0x31   :  { %s521_s7 = sld [smem:[#allocation6 + $0x18]]  ;;  %s537_s12 = sld [smem:[#allocation6 + $0x19]] }
  0x32   :  { %s523_s8 = sld [smem:[#allocation7]]  ;;  %s545_s13 = sld [smem:[#allocation7 + $0x1]] }
  0x33   :  { %s552_s14 = sld [smem:[#allocation6 + $0x2]]  ;;  %s583_s19 = sld [smem:[#allocation6 + $0x3]] }
  0x34   :  { %v55_v6 = vstv %s54_s5  ;;  %s554_s15 = sld [smem:[#allocation6 + $0xa]]  ;;  %v91_v22 = vstv %s527_s9  ;;  %s585_s20 = sld [smem:[#allocation6 + $0xb]] }
  0x35   :  { %v61_v7 = vstv %s517_s6  ;;  %v56_v10 = vmul.f32 %v55_v6, %v525_v0  ;;  %v57_v17 = vmul.f32 %v55_v6, %v541_v4  ;;  %s564_s16 = sld [smem:[#allocation6 + $0x12]]  ;;  %v97_v23 = vstv %s529_s10  ;;  %s588_s21 = sld [smem:[#allocation6 + $0x13]] }
  0x36   :  { %v62_v11 = vmul.f32 %v61_v7, %v531_v1  ;;  %v69_v12 = vstv %s519_s2  ;;  %s566_s17 = sld [smem:[#allocation6 + $0x1a]]  ;;  %v63_v19 = vmul.f32 %v61_v7, %v543_v5  ;;  %v105_v24 = vstv %s535_s11  ;;  %s594_s22 = sld [smem:[#allocation6 + $0x1b]] }
  0x37   :  { %v77_v13 = vstv %s521_s7  ;;  %v70_v14 = vmul.f32 %v69_v12, %v533_v2  ;;  %v71_v20 = vmul.f32 %v69_v12, %v548_v8  ;;  %v113_v25 = vstv %s537_s12  ;;  %s575_s18 = sld [smem:[#allocation7 + $0x2]]  ;;  %s596_s23 = sld [smem:[#allocation7 + $0x3]] }
  0x38   :  { %v78_v15 = vmul.f32 %v77_v13, %v539_v3  ;;  %v83_v16 = vstv %s523_s8  ;;  %v64_v18 = vadd.f32 %v62_v11, %v56_v10  ;;  %v79_v21 = vmul.f32 %v77_v13, %v550_v9  ;;  %s603_s24 = sld [smem:[#allocation6 + $0x4]]  ;;  %s626_s28 = sld [smem:[#allocation6 + $0x5]] }
  0x39   :  { %v65_v27 = vadd.f32 %v63_v19, %v57_v17  ;;  %v92_v28 = vmul.f32 %v91_v22, %v525_v0  ;;  %v98_v29 = vmul.f32 %v97_v23, %v531_v1  ;;  %v106_v30 = vmul.f32 %v105_v24, %v533_v2  ;;  %s608_s1 = sld [smem:[#allocation6 + $0xc]]  ;;  %s630_s29 = sld [smem:[#allocation6 + $0xd]] }
  0x3a   :  { %v72_v26 = vadd.f32 %v70_v14, %v64_v18  ;;  %v114_v31 = vmul.f32 %v113_v25, %v539_v3  ;;  %v119_v32 = vstv %s545_s13  ;;  %v93_v33 = vmul.f32 %v91_v22, %v541_v4  ;;  %s610_s25 = sld [smem:[#allocation6 + $0x14]]  ;;  %s635_s30 = sld [smem:[#allocation6 + $0x15]] }
  0x3b   :  { %v73_v35 = vadd.f32 %v71_v20, %v65_v27  ;;  %v100_v36 = vadd.f32 %v98_v29, %v92_v28  ;;  %v99_v37 = vmul.f32 %v97_v23, %v543_v5  ;;  %v107_v38 = vmul.f32 %v105_v24, %v548_v8  ;;  %s617_s26 = sld [smem:[#allocation6 + $0x1c]]  ;;  %s637_s4 = sld [smem:[#allocation6 + $0x1d]] }
  0x3c   :  { %v80_v34 = vadd.f32 %v78_v15, %v72_v26  ;;  %v115_v39 = vmul.f32 %v113_v25, %v550_v9  ;;  %v127_v40 = vstv %s552_s14  ;;  %v133_v41 = vstv %s554_s15  ;;  %s619_s27 = sld [smem:[#allocation7 + $0x4]]  ;;  %s644_s0 = sld [smem:[#allocation7 + $0x5]] }
  0x3d   :  { %v81_v43 = vadd.f32 %v79_v21, %v73_v35  ;;  %v108_v44 = vadd.f32 %v106_v30, %v100_v36  ;;  %v101_v45 = vadd.f32 %v99_v37, %v93_v33  ;;  %v128_v46 = vmul.f32 %v127_v40, %v525_v0  ;;  %s651_s5 = sld [smem:[#allocation6 + $0x6]]  ;;  %s673_s9 = sld [smem:[#allocation6 + $0x7]] }
  0x3e   :  { %v84_v42 = vadd.f32 %v83_v16, %v80_v34  ;;  %v134_v47 = vmul.f32 %v133_v41, %v531_v1  ;;  %v141_v48 = vstv %s564_s16  ;;  %v149_v49 = vstv %s566_s17  ;;  %s653_s6 = sld [smem:[#allocation6 + $0xe]]  ;;  %s675_s10 = sld [smem:[#allocation6 + $0xf]] }
  0x3f   :  { %v85_v50 = vadd.f32 %v83_v16, %v81_v43  ;;  %v116_v51 = vadd.f32 %v114_v31, %v108_v44  ;;  %v109_v52 = vadd.f32 %v107_v38, %v101_v45  ;;  %v142_v53 = vmul.f32 %v141_v48, %v533_v2  ;;  %s657_s2 = sld [smem:[#allocation6 + $0x16]]  ;;  %s682_s11 = sld [smem:[#allocation6 + $0x17]] }
  0x40   :  { %86 = vst [vmem:[#allocation9] sm:$0xff] %v84_v42  ;;  %v136_v54 = vadd.f32 %v134_v47, %v128_v46  ;;  %v150_v55 = vmul.f32 %v149_v49, %v539_v3  ;;  %v155_v56 = vstv %s575_s18  ;;  %v129_v57 = vmul.f32 %v127_v40, %v541_v4  ;;  %s662_s7 = sld [smem:[#allocation6 + $0x1e]]  ;;  %s684_s12 = sld [smem:[#allocation6 + $0x1f]] }
  0x41   :  { %87 = vst [vmem:[#allocation9 + $0x8] sm:$0xff] %v85_v50  ;;  %v120_v58 = vadd.f32 %v119_v32, %v116_v51  ;;  %v117_v59 = vadd.f32 %v115_v39, %v109_v52  ;;  %v135_v60 = vmul.f32 %v133_v41, %v543_v5  ;;  %v143_v61 = vmul.f32 %v141_v48, %v548_v8  ;;  %s666_s8 = sld [smem:[#allocation7 + $0x6]]  ;;  %s696_s13 = sld [smem:[#allocation7 + $0x7]] }
  0x42   :  { %v144_v62 = vadd.f32 %v142_v53, %v136_v54  ;;  %v151_v63 = vmul.f32 %v149_v49, %v550_v9  ;;  %v163_v6 = vstv %s583_s19  ;;  %v169_v7 = vstv %s585_s20  ;;  %s478_s14 = smov [#allocation9]  }
  0x43   :  { %122 = vst [vmem:[#allocation9 + $0x10] sm:$0xff] %v120_v58  ;;  %v121_v10 = vadd.f32 %v119_v32, %v117_v59  ;;  %v137_v11 = vadd.f32 %v135_v60, %v129_v57  ;;  %v164_v12 = vmul.f32 %v163_v6, %v525_v0  ;;  %v170_v13 = vmul.f32 %v169_v7, %v531_v1  ;;  %s346_s15 = sshll.u32 %s478_s14, 4  ;;  %s347_s15 = int_to_ptr.vmem [resolvable:$true] %s346_s15 }
  0x44   :  { %v152_v14 = vadd.f32 %v150_v55, %v144_v62  ;;  %v177_v15 = vstv %s588_s21  ;;  %v185_v16 = vstv %s594_s22  ;;  %v191_v17 = vstv %s596_s23  ;;  %s445_s16 = scalar_lea.vmem %s347_s15, 2048  ;;  %p450_p5 = scmp.lt.s32.totalorder %s347_s15, %s347_s15 }
  0x45   :  { %123 = vst [vmem:[#allocation9 + $0x18] sm:$0xff] %v121_v10  ;;  %v145_v18 = vadd.f32 %v143_v61, %v137_v11  ;;  %v172_v19 = vadd.f32 %v170_v13, %v164_v12  ;;  %v178_v20 = vmul.f32 %v177_v15, %v533_v2  ;;  %v186_v21 = vmul.f32 %v185_v16, %v539_v3  ;;  %p446_p4 = scmp.ne.s32.totalorder %s347_s15, %s445_s16  ;;  %p451_p6 = scmp.lt.s32.totalorder %s445_s16, %s445_s16 }
  0x46   :  { %v156_v22 = vadd.f32 %v155_v56, %v152_v14  ;;  %v165_v23 = vmul.f32 %v163_v6, %v541_v4  ;;  %v171_v24 = vmul.f32 %v169_v7, %v543_v5  ;;  %v179_v25 = vmul.f32 %v177_v15, %v548_v8 }
  0x47   :  { %v153_v26 = vadd.f32 %v151_v63, %v145_v18  ;;  %v180_v27 = vadd.f32 %v178_v20, %v172_v19  ;;  %v187_v28 = vmul.f32 %v185_v16, %v550_v9  ;;  %v199_v29 = vstv %s603_s24  ;;  %p452_p7 = por %p451_p6, %p450_p5 }
  0x48   :  { %158 = vst [vmem:[#allocation9 + $0x20] sm:$0xff] %v156_v22  ;;  %v173_v30 = vadd.f32 %v171_v24, %v165_v23  ;;  %v200_v31 = vmul.f32 %v199_v29, %v525_v0  ;;  %v205_v32 = vstv %s608_s1  ;;  %v213_v33 = vstv %s610_s25 }
  0x49   :  { %v157_v34 = vadd.f32 %v155_v56, %v153_v26  ;;  %v188_v35 = vadd.f32 %v186_v21, %v180_v27  ;;  %v206_v36 = vmul.f32 %v205_v32, %v531_v1  ;;  %v214_v37 = vmul.f32 %v213_v33, %v533_v2  ;;  %p453_p8 = pnand %p452_p7, %p446_p4 }
  0x4a   :  { %v181_v38 = vadd.f32 %v179_v25, %v173_v30  ;;  %v221_v39 = vstv %s617_s26  ;;  %v227_v40 = vstv %s619_s27  ;;  %v201_v41 = vmul.f32 %v199_v29, %v541_v4 }
  0x4b   :  { %159 = vst [vmem:[#allocation9 + $0x28] sm:$0xff] %v157_v34  ;;  %v192_v42 = vadd.f32 %v191_v17, %v188_v35  ;;  %v208_v43 = vadd.f32 %v206_v36, %v200_v31  ;;  %v222_v44 = vmul.f32 %v221_v39, %v539_v3  ;;  %v207_v45 = vmul.f32 %v205_v32, %v543_v5 }
  0x4c   :  { %v189_v46 = vadd.f32 %v187_v28, %v181_v38  ;;  %v215_v47 = vmul.f32 %v213_v33, %v548_v8  ;;  %v223_v48 = vmul.f32 %v221_v39, %v550_v9  ;;  %v235_v49 = vstv %s626_s28 }
  0x4d   :  { %194 = vst [vmem:[#allocation9 + $0x30] sm:$0xff] %v192_v42  ;;  %v216_v50 = vadd.f32 %v214_v37, %v208_v43  ;;  %v209_v51 = vadd.f32 %v207_v45, %v201_v41  ;;  %v236_v52 = vmul.f32 %v235_v49, %v525_v0  ;;  %v241_v53 = vstv %s630_s29 }
  0x4e   :  { %v193_v54 = vadd.f32 %v191_v17, %v189_v46  ;;  %v242_v55 = vmul.f32 %v241_v53, %v531_v1  ;;  %v249_v56 = vstv %s635_s30  ;;  %v257_v57 = vstv %s637_s4 }
  0x4f   :  { %v224_v58 = vadd.f32 %v222_v44, %v216_v50  ;;  %v217_v59 = vadd.f32 %v215_v47, %v209_v51  ;;  %v250_v60 = vmul.f32 %v249_v56, %v533_v2  ;;  %v258_v61 = vmul.f32 %v257_v57, %v539_v3 }
  0x50   :  { %195 = vst [vmem:[#allocation9 + $0x38] sm:$0xff] %v193_v54  ;;  %v244_v62 = vadd.f32 %v242_v55, %v236_v52  ;;  %v263_v63 = vstv %s644_s0  ;;  %v237_v6 = vmul.f32 %v235_v49, %v541_v4  ;;  %v243_v7 = vmul.f32 %v241_v53, %v543_v5 }
  0x51   :  { %v228_v10 = vadd.f32 %v227_v40, %v224_v58  ;;  %v225_v11 = vadd.f32 %v223_v48, %v217_v59  ;;  %v251_v12 = vmul.f32 %v249_v56, %v548_v8  ;;  %v259_v13 = vmul.f32 %v257_v57, %v550_v9 }
  0x52   :  { %v252_v14 = vadd.f32 %v250_v60, %v244_v62  ;;  %v245_v15 = vadd.f32 %v243_v7, %v237_v6  ;;  %v271_v16 = vstv %s651_s5  ;;  %v277_v17 = vstv %s653_s6 }
  0x53   :  { %230 = vst [vmem:[#allocation9 + $0x40] sm:$0xff] %v228_v10  ;;  %v229_v18 = vadd.f32 %v227_v40, %v225_v11  ;;  %v272_v19 = vmul.f32 %v271_v16, %v525_v0  ;;  %v278_v20 = vmul.f32 %v277_v17, %v531_v1  ;;  %v285_v21 = vstv %s657_s2 }
  0x54   :  { %v260_v22 = vadd.f32 %v258_v61, %v252_v14  ;;  %v253_v23 = vadd.f32 %v251_v12, %v245_v15  ;;  %v286_v24 = vmul.f32 %v285_v21, %v533_v2  ;;  %v293_v25 = vstv %s662_s7 }
  0x55   :  { %231 = vst [vmem:[#allocation9 + $0x48] sm:$0xff] %v229_v18  ;;  %v280_v26 = vadd.f32 %v278_v20, %v272_v19  ;;  %v294_v27 = vmul.f32 %v293_v25, %v539_v3  ;;  %v299_v28 = vstv %s666_s8  ;;  %v273_v29 = vmul.f32 %v271_v16, %v541_v4 }
  0x56   :  { %v264_v30 = vadd.f32 %v263_v63, %v260_v22  ;;  %v261_v31 = vadd.f32 %v259_v13, %v253_v23  ;;  %v279_v32 = vmul.f32 %v277_v17, %v543_v5  ;;  %v287_v33 = vmul.f32 %v285_v21, %v548_v8 }
  0x57   :  { %v288_v34 = vadd.f32 %v286_v24, %v280_v26  ;;  %v295_v35 = vmul.f32 %v293_v25, %v550_v9  ;;  %v307_v36 = vstv %s673_s9  ;;  %v313_v37 = vstv %s675_s10 }
  0x58   :  { %266 = vst [vmem:[#allocation9 + $0x50] sm:$0xff] %v264_v30  ;;  %v265_v38 = vadd.f32 %v263_v63, %v261_v31  ;;  %v281_v39 = vadd.f32 %v279_v32, %v273_v29  ;;  %v308_v40 = vmul.f32 %v307_v36, %v525_v0  ;;  %v314_v41 = vmul.f32 %v313_v37, %v531_v1 }
  0x59   :  { %v296_v42 = vadd.f32 %v294_v27, %v288_v34  ;;  %v321_v43 = vstv %s682_s11  ;;  %v329_v44 = vstv %s684_s12  ;;  %v309_v50 = vmul.f32 %v307_v36, %v541_v4 }
  0x5a   :  { %267 = vst [vmem:[#allocation9 + $0x58] sm:$0xff] %v265_v38  ;;  %v289_v45 = vadd.f32 %v287_v33, %v281_v39  ;;  %v316_v46 = vadd.f32 %v314_v41, %v308_v40  ;;  %v322_v47 = vmul.f32 %v321_v43, %v533_v2  ;;  %v330_v48 = vmul.f32 %v329_v44, %v539_v3 }
  0x5b   :  { %v300_v49 = vadd.f32 %v299_v28, %v296_v42  ;;  %v315_v51 = vmul.f32 %v313_v37, %v543_v5  ;;  %v323_v0 = vmul.f32 %v321_v43, %v548_v8  ;;  %v335_v53 = vstv %s696_s13 }
  0x5c   :  { %v297_v52 = vadd.f32 %v295_v35, %v289_v45  ;;  %v324_v1 = vadd.f32 %v322_v47, %v316_v46  ;;  %v331_v55 = vmul.f32 %v329_v44, %v550_v9 }
  0x5d   :  { %302 = vst [vmem:[#allocation9 + $0x60] sm:$0xff] %v300_v49  ;;  %v317_v54 = vadd.f32 %v315_v51, %v309_v50 }
  0x5e   :  { %v301_v56 = vadd.f32 %v299_v28, %v297_v52  ;;  %v332_v57 = vadd.f32 %v330_v48, %v324_v1 }
  0x5f   :  { %v325_v58 = vadd.f32 %v323_v0, %v317_v54 }
  0x60   :  { %303 = vst [vmem:[#allocation9 + $0x68] sm:$0xff] %v301_v56  ;;  %v336_v2 = vadd.f32 %v335_v53, %v332_v57 }
  0x61   :  { %v333_v3 = vadd.f32 %v331_v55, %v325_v58 }
  0x62   :  { %338 = vst [vmem:[#allocation9 + $0x70] sm:$0xff] %v336_v2 }
  0x63   :  { %v337_v4 = vadd.f32 %v335_v53, %v333_v3 }
  0x65   :  { %339 = vst [vmem:[#allocation9 + $0x78] sm:$0xff] %v337_v4 }
  0x66   :  { %456 = shalt.err (!%p453_p8)
}
  0x67   :  { %s457_s19 = scalar_lea.hbm %s729_s3, 2048 }
  0x68   :  { %p458_p9 = scmp.ne.s32.totalorder %s729_s3, %s457_s19  ;;  %p461_p10 = scmp.lt.u32.totalorder %s457_s19, %s729_s3 }
  0x6a   :  { %p463_p11 = pnand %p461_p10, %p458_p9 }
  0x6c   :  { %466 = shalt.err (!%p463_p11)
}
  0x6d   :  { %349 = dma.vmem_to_hbm [thread:$0]  %s347_s15, 2048, %s729_s3, [#allocation4]  }
  0x6e   :  { %473 = dma.done.wait [#allocation4], 2048  }
  0x6f   :  { %474 = vsyncadd [#allocation4], 4294965248 }
  0x70   :  { %353 = vsyncpa [#allocation3], 1 }
  0x71   :  { %354 = vsyncpa [#allocation4], 1 }
  0x72   :  { %355 = vsyncpa [#allocation5], 1 }
  0x73   :  { %356 = vsyncpa [#allocation8], 1 }

</bundles_post_ra>
